<compile_context>
chip_gen: v7x
topology: tpu7x:2x2x1
jax: 0.10.0
libtpu: 0.0.40
codegen_flags: <defaults>
</compile_context>

<pallas_src>
import functools

import jax
import jax.numpy as jnp
from jax import lax
from jax.experimental import pallas as pl
from jax.experimental.pallas import tpu as pltpu


def _dsconv_kernel(x_ref, dww_ref, bn1b_ref, wred_ref, bred_ref,
                   wexp_ref, bexp_ref, wpw_ref, bn2b_ref, o_ref,
                   *, H, W, C, has_residual, pw_dtype):
    # Shapes (per grid step), all lane-packed along (w, c):
    #   x_ref   : (Bt*H, W*C)      input rows, also the residual
    #   dww_ref : (3, 3, W*C)      depthwise weights, BN1 scale folded, tiled over W
    #   bn1b_ref: (1, W*C)         BN1 bias, tiled over W
    #   wred_ref: (C, Cr), bred_ref: (1, Cr)    SE reduce
    #   wexp_ref: (Cr, C), bexp_ref: (1, C)     SE expand
    #   wpw_ref : (W*C, W*Cout)    block-diagonal pointwise weights, BN2 scale folded
    #   bn2b_ref: (1, W*Cout)      BN2 bias, tiled over W
    #   o_ref   : (Bt*H, W*Cout)
    R, L = x_ref.shape
    Bt = R // H

    x = x_ref[...]                              # single HBM->VMEM read, reused as residual

    # ---- halo masks: per-lane / per-row constants (tiny tiles, no per-pixel div/mod) --
    col = lax.broadcasted_iota(jnp.int32, (1, L), 1)
    left_ok = col >= C                          # w > 0
    right_ok = col < (W - 1) * C                # w < W-1
    hrow = lax.broadcasted_iota(jnp.int32, (R, 1), 0) % H
    up_ok = hrow > 0                            # h > 0
    down_ok = hrow < H - 1                      # h < H-1

    # ---- depthwise 3x3, stride 1, zero pad 1 (BN1 scale already folded) ---------------
    # Horizontal taps: lane rolls by +-C; any wrap across a row's w=0 / w=W-1 boundary
    # lands exactly on the masked lanes.
    left = jnp.where(left_ok, pltpu.roll(x, shift=C, axis=1), 0.0)        # x[h, w-1, c]
    right = jnp.where(right_ok, pltpu.roll(x, shift=L - C, axis=1), 0.0)  # x[h, w+1, c]

    def _hrow_sum(ki):   # sum over kj of x[h, w+kj-1] * dw[ki, kj]
        return (left * dww_ref[ki, 0, :] + x * dww_ref[ki, 1, :]
                + right * dww_ref[ki, 2, :])

    s0, s1, s2 = _hrow_sum(0), _hrow_sum(1), _hrow_sum(2)
    # Vertical taps: 1-sublane rolls; cross-row/cross-batch wraps land on masked rows.
    up = jnp.where(up_ok, pltpu.roll(s0, shift=1, axis=0), 0.0)           # s0[h-1]
    down = jnp.where(down_ok, pltpu.roll(s2, shift=R - 1, axis=0), 0.0)   # s2[h+1]
    acc = up + s1 + down                                                   # (R, L)

    # ---- BN1 bias + swish --------------------------------------------------------------
    y = acc + bn1b_ref[0]
    y = y * jax.nn.sigmoid(y)

    # ---- Squeeze-Excite (per batch element); tiny C -> keep it on the VPU/XLU ----------
    y3 = y.reshape(Bt, H, L)                                   # leading-dim split (layout-safe)
    se = jnp.sum(jnp.sum(y3, axis=1).reshape(Bt, W, C), axis=1) * (1.0 / (H * W))  # (Bt, C)
    red = jnp.sum(se[:, :, None] * wred_ref[...][None, :, :], axis=1) + bred_ref[0]
    red = red * jax.nn.sigmoid(red)                             # swish
    ex = jnp.sum(red[:, :, None] * wexp_ref[...][None, :, :], axis=1) + bexp_ref[0]
    gate = jax.nn.sigmoid(ex)                                   # (Bt, C)
    gate_l = jnp.tile(gate, (1, W))                             # (Bt, W*C), w-major packing
    yg = (y3 * gate_l[:, None, :]).reshape(R, L)

    # ---- pointwise 1x1 conv (block-diagonal weight, BN2 scale folded) + BN2 bias -------
    # One MXU pass on the lane-dense layout; output is lane-dense so stores are unmasked.
    z = jnp.dot(yg.astype(pw_dtype), wpw_ref[...],
                preferred_element_type=jnp.float32) + bn2b_ref[0]          # (R, W*Cout)

    if has_residual:
        z = z + x                               # in_chs == out_chs, stride 1

    o_ref[...] = z.astype(o_ref.dtype)


def _vmem_budgets():
    """(per-step block budget, vmem_limit ceiling) — generation aware."""
    try:
        cap = int(pltpu.get_tpu_info().vmem_capacity_bytes)
    except Exception:            # interpret mode / older runtimes: assume 128 MiB parts
        cap = 128 << 20
    if cap <= (64 << 20):        # v7x: 64 MiB per TensorCore -> leave headroom
        return 12 << 20, 48 << 20
    return 48 << 20, 100 << 20   # v5e / v6e: 128 MiB -> bigger resident blocks


def _pick_batch_block(B, H, W, C, Cout, budget_bytes):
    """Largest divisor of B that fits the budget, keeping >=2 grid steps when possible."""
    # double-buffered in/out blocks + ~10 live f32 temporaries per batch element
    per_elem = H * W * 4 * (2 * (C + Cout) + 10 * max(C, Cout))
    bt = max(1, min(B, budget_bytes // max(per_elem, 1)))
    if B >= 2:
        bt = min(bt, max(1, B // 2))     # >=2 steps on the parallel axis (v7x: 2 TCs)
    while bt > 1 and B % bt:
        bt -= 1
    if (bt * H) % 8 != 0:                # sublane divisibility of the block rows
        bt = B
    return int(bt)


def depthwise_separable_conv(x_nhwc, params, *, has_residual, pw_dtype=jnp.float32):
    """x_nhwc: (B, H, W, C) float32.  params: dict of NHWC-layout parameters.

    pw_dtype feeds the pointwise MXU matmul (weights cast once in the wrapper).
    bf16 is the recommended setting on v6e/v7x at production channel counts
    (accumulation stays f32); f32 keeps the demo comparison tight.
    """
    B, H, W, C = x_nhwc.shape
    Cout = params["wpw"].shape[1]
    Cr = params["wred"].shape[1]
    L, Lo = W * C, W * Cout

    # ---- fold BN scales into conv weights; pack everything into the (w, c) lane layout -
    dww = params["dww"] * params["bn1_scale"].reshape(1, 1, C)          # (3,3,C)
    dww_packed = jnp.tile(dww, (1, 1, W))                               # (3,3,W*C)
    bn1b_packed = jnp.tile(params["bn1_bias"].reshape(1, C), (1, W))    # (1,W*C)
    wpw_folded = params["wpw"] * params["bn2_scale"]                    # (C,Cout)
    wpw_bd = jnp.kron(jnp.eye(W, dtype=wpw_folded.dtype), wpw_folded).astype(pw_dtype)
    bn2b_packed = jnp.tile(params["bn2_bias"].reshape(1, Cout), (1, W))  # (1,W*Cout)

    x2 = x_nhwc.reshape(B * H, L)                                        # lane-dense view

    budget, ceiling = _vmem_budgets()
    Bt = _pick_batch_block(B, H, W, C, Cout, budget)
    nb = B // Bt

    vmem_est = 4 * Bt * H * W * (2 * (C + Cout) + 10 * max(C, Cout)) + (2 << 20)
    vmem_limit = int(min(max(vmem_est, 32 << 20), ceiling))

    weight_bytes = int(4 * (dww_packed.size + bn1b_packed.size + params["wred"].size
                            + params["bred"].size + params["wexp"].size
                            + params["bexp"].size + bn2b_packed.size)
                       + wpw_bd.size * jnp.dtype(pw_dtype).itemsize)
    cost = pl.CostEstimate(
        flops=int(B * H * W * (18 * C + 2 * C * Cout + 12 * C) + 4 * B * C * Cr),
        transcendentals=int(B * H * W * C + B * (2 * Cr + 2 * C)),
        bytes_accessed=int(4 * B * H * W * (C + Cout)) + weight_bytes)

    kernel = functools.partial(_dsconv_kernel, H=H, W=W, C=C,
                               has_residual=has_residual, pw_dtype=pw_dtype)

    grid_spec = pltpu.PrefetchScalarGridSpec(
        num_scalar_prefetch=0,
        grid=(nb,),
        in_specs=[
            pl.BlockSpec((Bt * H, L), lambda b: (b, 0)),     # x (input + residual)
            pl.BlockSpec((3, 3, L), lambda b: (0, 0, 0)),    # dw weights (*BN1 scale)
            pl.BlockSpec((1, L), lambda b: (0, 0)),          # BN1 bias
            pl.BlockSpec((C, Cr), lambda b: (0, 0)),         # SE reduce W
            pl.BlockSpec((1, Cr), lambda b: (0, 0)),         # SE reduce b
            pl.BlockSpec((Cr, C), lambda b: (0, 0)),         # SE expand W
            pl.BlockSpec((1, C), lambda b: (0, 0)),          # SE expand b
            pl.BlockSpec((L, Lo), lambda b: (0, 0)),         # pw weights, block-diag (*BN2 scale)
            pl.BlockSpec((1, Lo), lambda b: (0, 0)),         # BN2 bias
        ],
        out_specs=pl.BlockSpec((Bt * H, Lo), lambda b: (b, 0)),
    )

    out2 = pl.pallas_call(
        kernel,
        out_shape=jax.ShapeDtypeStruct((B * H, Lo), jnp.float32),
        grid_spec=grid_spec,
        compiler_params=pltpu.CompilerParams(
            dimension_semantics=("parallel",),
            vmem_limit_bytes=vmem_limit),
        cost_estimate=cost,
    )(x2, dww_packed, bn1b_packed, params["wred"], params["bred"],
      params["wexp"], params["bexp"], wpw_bd, bn2b_packed)

    return out2.reshape(B, H, W, Cout)


def _fold_bn(gamma, beta, mean, var, eps=1e-5):
    scale = gamma / jnp.sqrt(var + eps)
    bias = beta - mean * scale
    return scale, bias


def _reference(x_nhwc, params, has_residual):
    # Pure-JAX reference (NHWC, unfolded BN form) for correctness check.
    B, H, W, C = x_nhwc.shape
    dw = params["dww"].reshape(3, 3, 1, C)
    y = lax.conv_general_dilated(
        x_nhwc, dw, window_strides=(1, 1), padding=((1, 1), (1, 1)),
        dimension_numbers=("NHWC", "HWIO", "NHWC"), feature_group_count=C,
        precision=lax.Precision.HIGHEST)
    y = y * params["bn1_scale"] + params["bn1_bias"]
    y = y * jax.nn.sigmoid(y)
    se = jnp.mean(y, axis=(1, 2))                                    # (B, C)
    se = jnp.einsum("bc,cr->br", se, params["wred"],
                    precision=lax.Precision.HIGHEST) + params["bred"]
    se = se * jax.nn.sigmoid(se)
    se = jnp.einsum("br,rc->bc", se, params["wexp"],
                    precision=lax.Precision.HIGHEST) + params["bexp"]
    gate = jax.nn.sigmoid(se)[:, None, None, :]
    y = y * gate
    z = jnp.einsum("bhwc,co->bhwo", y, params["wpw"],
                   precision=lax.Precision.HIGHEST)
    z = z * params["bn2_scale"] + params["bn2_bias"]
    if has_residual:
        z = z + x_nhwc
    return z


if __name__ == "__main__":
    B, C, H, W = 2, 4, 16, 16
    Cout = C                       # in_chs == out_chs -> has_residual = True
    Cr = max(1, int(C * 0.25))
    has_residual = (C == Cout)

    key = jax.random.PRNGKey(0)
    ks = jax.random.split(key, 16)

    # input (NCHW like PyTorch), then transpose to NHWC for the kernel
    x_nchw = jax.random.normal(ks[0], (B, C, H, W), jnp.float32)
    x_nhwc = jnp.transpose(x_nchw, (0, 2, 3, 1))

    # depthwise conv weight: torch (C,1,3,3) -> NHWC-style (3,3,C)
    dww = 0.2 * jax.random.normal(ks[1], (3, 3, C), jnp.float32)

    # BN1 / BN2 (inference) parameters, folded into scale/bias
    bn1_scale, bn1_bias = _fold_bn(
        1.0 + 0.1 * jax.random.normal(ks[2], (C,)), 0.1 * jax.random.normal(ks[3], (C,)),
        0.1 * jax.random.normal(ks[4], (C,)), 1.0 + 0.05 * jax.random.uniform(ks[5], (C,)))
    bn2_scale, bn2_bias = _fold_bn(
        1.0 + 0.1 * jax.random.normal(ks[6], (Cout,)), 0.1 * jax.random.normal(ks[7], (Cout,)),
        0.1 * jax.random.normal(ks[8], (Cout,)), 1.0 + 0.05 * jax.random.uniform(ks[9], (Cout,)))

    # SqueezeExcite 1x1 convs: torch (Cr,C,1,1)/(C,Cr,1,1) -> matmul layout (C,Cr)/(Cr,C)
    wred = 0.3 * jax.random.normal(ks[10], (C, Cr), jnp.float32)
    bred = 0.1 * jax.random.normal(ks[11], (Cr,), jnp.float32)
    wexp = 0.3 * jax.random.normal(ks[12], (Cr, C), jnp.float32)
    bexp = 0.1 * jax.random.normal(ks[13], (C,), jnp.float32)

    # pointwise conv: torch (Cout,C,1,1) -> (C, Cout)
    wpw = 0.3 * jax.random.normal(ks[14], (C, Cout), jnp.float32)

    params = {
        "dww": dww,
        "bn1_scale": bn1_scale.reshape(1, C), "bn1_bias": bn1_bias.reshape(1, C),
        "wred": wred, "bred": bred.reshape(1, Cr),
        "wexp": wexp, "bexp": bexp.reshape(1, C),
        "wpw": wpw,
        "bn2_scale": bn2_scale.reshape(1, Cout), "bn2_bias": bn2_bias.reshape(1, Cout),
    }

    out = depthwise_separable_conv(x_nhwc, params, has_residual=has_residual)
    out = jax.block_until_ready(out)

    with jax.default_matmul_precision("highest"):
        ref = jax.block_until_ready(_reference(x_nhwc, params, has_residual))

    assert jnp.allclose(out, ref, atol=2e-3, rtol=2e-3), "mismatch vs JAX reference"

    # TODO(synk): drop_connect (stochastic depth) not implemented — drop_connect_rate=0.0 path only.
    # TODO(synk): training-mode BatchNorm (batch statistics) not implemented — BN folded for inference.
    print("KERNEL_OK")
</pallas_src>

<mosaic_0001>
module attributes {stable_mosaic.version = 11 : i64} {
  func.func @_dsconv_kernel(%arg0: i32, %arg1: memref<16x64xf32, #tpu.memory_space<vmem>>, %arg2: memref<3x3x64xf32, #tpu.memory_space<vmem>>, %arg3: memref<1x64xf32, #tpu.memory_space<vmem>>, %arg4: memref<4x1xf32, #tpu.memory_space<vmem>>, %arg5: memref<1x1xf32, #tpu.memory_space<vmem>>, %arg6: memref<1x4xf32, #tpu.memory_space<vmem>>, %arg7: memref<1x4xf32, #tpu.memory_space<vmem>>, %arg8: memref<64x64xf32, #tpu.memory_space<vmem>>, %arg9: memref<1x64xf32, #tpu.memory_space<vmem>>, %arg10: memref<16x64xf32, #tpu.memory_space<vmem>>) attributes {dimension_semantics = [#tpu.dimension_semantics<parallel>], iteration_bounds = array<i64: 2>, scalar_prefetch = 0 : i64, scratch_operands = 0 : i64, tpu.core_type = #tpu.core_type<tc>, window_params = [{transform_indices = @transform_0, window_bounds = array<i64: 16, 64>}, {pipeline_mode = #tpu.pipeline_mode<synchronous>, transform_indices = @transform_1, window_bounds = array<i64: 3, 3, 64>}, {pipeline_mode = #tpu.pipeline_mode<synchronous>, transform_indices = @transform_2, window_bounds = array<i64: 1, 64>}, {pipeline_mode = #tpu.pipeline_mode<synchronous>, transform_indices = @transform_3, window_bounds = array<i64: 4, 1>}, {pipeline_mode = #tpu.pipeline_mode<synchronous>, transform_indices = @transform_4, window_bounds = array<i64: 1, 1>}, {pipeline_mode = #tpu.pipeline_mode<synchronous>, transform_indices = @transform_5, window_bounds = array<i64: 1, 4>}, {pipeline_mode = #tpu.pipeline_mode<synchronous>, transform_indices = @transform_6, window_bounds = array<i64: 1, 4>}, {pipeline_mode = #tpu.pipeline_mode<synchronous>, transform_indices = @transform_7, window_bounds = array<i64: 64, 64>}, {pipeline_mode = #tpu.pipeline_mode<synchronous>, transform_indices = @transform_8, window_bounds = array<i64: 1, 64>}, {transform_indices = @transform_9, window_bounds = array<i64: 16, 64>}]} {
    %c0 = arith.constant 0 : index
    %c0_0 = arith.constant 0 : index
    %0 = vector.load %arg1[%c0, %c0_0] : memref<16x64xf32, #tpu.memory_space<vmem>>, vector<16x64xf32>
    %1 = tpu.iota {dimensions = array<i32: 1>} : vector<1x64xi32>
    %c4_i32 = arith.constant 4 : i32
    %2 = vector.broadcast %c4_i32 : i32 to vector<1x64xi32>
    %3 = arith.cmpi sge, %1, %2 : vector<1x64xi32>
    %c60_i32 = arith.constant 60 : i32
    %4 = vector.broadcast %c60_i32 : i32 to vector<1x64xi32>
    %5 = arith.cmpi slt, %1, %4 : vector<1x64xi32>
    %6 = tpu.iota {dimensions = array<i32: 0>} : vector<16x1xi32>
    %c16_i32 = arith.constant 16 : i32
    %c0_i32 = arith.constant 0 : i32
    %7 = arith.cmpi eq, %c16_i32, %c0_i32 : i32
    %c1_i32 = arith.constant 1 : i32
    %8 = arith.select %7, %c1_i32, %c16_i32 : i32
    %9 = vector.broadcast %8 : i32 to vector<16x1xi32>
    %10 = arith.remsi %6, %9 : vector<16x1xi32>
    %c0_i32_1 = arith.constant 0 : i32
    %11 = vector.broadcast %c0_i32_1 : i32 to vector<16x1xi32>
    %12 = arith.cmpi ne, %10, %11 : vector<16x1xi32>
    %c0_i32_2 = arith.constant 0 : i32
    %13 = vector.broadcast %c0_i32_2 : i32 to vector<16x1xi32>
    %14 = arith.cmpi slt, %10, %13 : vector<16x1xi32>
    %c0_i32_3 = arith.constant 0 : i32
    %15 = arith.cmpi slt, %8, %c0_i32_3 : i32
    %16 = vector.broadcast %15 : i1 to vector<16x1xi1>
    %17 = vector.broadcast %16 : vector<16x1xi1> to vector<16x1xi1>
    %18 = arith.xori %14, %17 : vector<16x1xi1>
    %19 = arith.andi %18, %12 : vector<16x1xi1>
    %20 = vector.broadcast %8 : i32 to vector<16x1xi32>
    %21 = arith.addi %10, %20 : vector<16x1xi32>
    %22 = arith.select %19, %21, %10 : vector<16x1xi1>, vector<16x1xi32>
    %c0_i32_4 = arith.constant 0 : i32
    %23 = vector.broadcast %c0_i32_4 : i32 to vector<16x1xi32>
    %24 = arith.cmpi sgt, %22, %23 : vector<16x1xi32>
    %c15_i32 = arith.constant 15 : i32
    %25 = vector.broadcast %c15_i32 : i32 to vector<16x1xi32>
    %26 = arith.cmpi slt, %22, %25 : vector<16x1xi32>
    %c4_i32_5 = arith.constant 4 : i32
    %27 = tpu.dynamic_rotate %0 by %c4_i32_5 dim 1 : vector<16x64xf32>, i32 -> vector<16x64xf32>
    %cst = arith.constant 0.000000e+00 : f32
    %28 = vector.shape_cast %3 : vector<1x64xi1> to vector<1x64xi1>
    %29 = vector.broadcast %28 : vector<1x64xi1> to vector<16x64xi1>
    %30 = vector.broadcast %cst : f32 to vector<16x64xf32>
    %31 = arith.select %29, %27, %30 : vector<16x64xi1>, vector<16x64xf32>
    %c60_i32_6 = arith.constant 60 : i32
    %32 = tpu.dynamic_rotate %0 by %c60_i32_6 dim 1 : vector<16x64xf32>, i32 -> vector<16x64xf32>
    %cst_7 = arith.constant 0.000000e+00 : f32
    %33 = vector.shape_cast %5 : vector<1x64xi1> to vector<1x64xi1>
    %34 = vector.broadcast %33 : vector<1x64xi1> to vector<16x64xi1>
    %35 = vector.broadcast %cst_7 : f32 to vector<16x64xf32>
    %36 = arith.select %34, %32, %35 : vector<16x64xi1>, vector<16x64xf32>
    %c0_8 = arith.constant 0 : index
    %c0_9 = arith.constant 0 : index
    %c0_10 = arith.constant 0 : index
    %37 = vector.load %arg2[%c0_8, %c0_9, %c0_10] : memref<3x3x64xf32, #tpu.memory_space<vmem>>, vector<1x1x64xf32>
    %38 = vector.shape_cast %37 : vector<1x1x64xf32> to vector<64xf32>
    %39 = vector.shape_cast %38 : vector<64xf32> to vector<1x64xf32>
    %40 = vector.broadcast %39 : vector<1x64xf32> to vector<16x64xf32>
    %41 = arith.mulf %31, %40 : vector<16x64xf32>
    %c0_11 = arith.constant 0 : index
    %c1 = arith.constant 1 : index
    %c0_12 = arith.constant 0 : index
    %42 = vector.load %arg2[%c0_11, %c1, %c0_12] : memref<3x3x64xf32, #tpu.memory_space<vmem>>, vector<1x1x64xf32>
    %43 = vector.shape_cast %42 : vector<1x1x64xf32> to vector<64xf32>
    %44 = vector.shape_cast %43 : vector<64xf32> to vector<1x64xf32>
    %45 = vector.broadcast %44 : vector<1x64xf32> to vector<16x64xf32>
    %46 = arith.mulf %0, %45 : vector<16x64xf32>
    %47 = arith.addf %41, %46 : vector<16x64xf32>
    %c0_13 = arith.constant 0 : index
    %c2 = arith.constant 2 : index
    %c0_14 = arith.constant 0 : index
    %48 = vector.load %arg2[%c0_13, %c2, %c0_14] : memref<3x3x64xf32, #tpu.memory_space<vmem>>, vector<1x1x64xf32>
    %49 = vector.shape_cast %48 : vector<1x1x64xf32> to vector<64xf32>
    %50 = vector.shape_cast %49 : vector<64xf32> to vector<1x64xf32>
    %51 = vector.broadcast %50 : vector<1x64xf32> to vector<16x64xf32>
    %52 = arith.mulf %36, %51 : vector<16x64xf32>
    %53 = arith.addf %47, %52 : vector<16x64xf32>
    %c1_15 = arith.constant 1 : index
    %c0_16 = arith.constant 0 : index
    %c0_17 = arith.constant 0 : index
    %54 = vector.load %arg2[%c1_15, %c0_16, %c0_17] : memref<3x3x64xf32, #tpu.memory_space<vmem>>, vector<1x1x64xf32>
    %55 = vector.shape_cast %54 : vector<1x1x64xf32> to vector<64xf32>
    %56 = vector.shape_cast %55 : vector<64xf32> to vector<1x64xf32>
    %57 = vector.broadcast %56 : vector<1x64xf32> to vector<16x64xf32>
    %58 = arith.mulf %31, %57 : vector<16x64xf32>
    %c1_18 = arith.constant 1 : index
    %c1_19 = arith.constant 1 : index
    %c0_20 = arith.constant 0 : index
    %59 = vector.load %arg2[%c1_18, %c1_19, %c0_20] : memref<3x3x64xf32, #tpu.memory_space<vmem>>, vector<1x1x64xf32>
    %60 = vector.shape_cast %59 : vector<1x1x64xf32> to vector<64xf32>
    %61 = vector.shape_cast %60 : vector<64xf32> to vector<1x64xf32>
    %62 = vector.broadcast %61 : vector<1x64xf32> to vector<16x64xf32>
    %63 = arith.mulf %0, %62 : vector<16x64xf32>
    %64 = arith.addf %58, %63 : vector<16x64xf32>
    %c1_21 = arith.constant 1 : index
    %c2_22 = arith.constant 2 : index
    %c0_23 = arith.constant 0 : index
    %65 = vector.load %arg2[%c1_21, %c2_22, %c0_23] : memref<3x3x64xf32, #tpu.memory_space<vmem>>, vector<1x1x64xf32>
    %66 = vector.shape_cast %65 : vector<1x1x64xf32> to vector<64xf32>
    %67 = vector.shape_cast %66 : vector<64xf32> to vector<1x64xf32>
    %68 = vector.broadcast %67 : vector<1x64xf32> to vector<16x64xf32>
    %69 = arith.mulf %36, %68 : vector<16x64xf32>
    %70 = arith.addf %64, %69 : vector<16x64xf32>
    %c2_24 = arith.constant 2 : index
    %c0_25 = arith.constant 0 : index
    %c0_26 = arith.constant 0 : index
    %71 = vector.load %arg2[%c2_24, %c0_25, %c0_26] : memref<3x3x64xf32, #tpu.memory_space<vmem>>, vector<1x1x64xf32>
    %72 = vector.shape_cast %71 : vector<1x1x64xf32> to vector<64xf32>
    %73 = vector.shape_cast %72 : vector<64xf32> to vector<1x64xf32>
    %74 = vector.broadcast %73 : vector<1x64xf32> to vector<16x64xf32>
    %75 = arith.mulf %31, %74 : vector<16x64xf32>
    %c2_27 = arith.constant 2 : index
    %c1_28 = arith.constant 1 : index
    %c0_29 = arith.constant 0 : index
    %76 = vector.load %arg2[%c2_27, %c1_28, %c0_29] : memref<3x3x64xf32, #tpu.memory_space<vmem>>, vector<1x1x64xf32>
    %77 = vector.shape_cast %76 : vector<1x1x64xf32> to vector<64xf32>
    %78 = vector.shape_cast %77 : vector<64xf32> to vector<1x64xf32>
    %79 = vector.broadcast %78 : vector<1x64xf32> to vector<16x64xf32>
    %80 = arith.mulf %0, %79 : vector<16x64xf32>
    %81 = arith.addf %75, %80 : vector<16x64xf32>
    %c2_30 = arith.constant 2 : index
    %c2_31 = arith.constant 2 : index
    %c0_32 = arith.constant 0 : index
    %82 = vector.load %arg2[%c2_30, %c2_31, %c0_32] : memref<3x3x64xf32, #tpu.memory_space<vmem>>, vector<1x1x64xf32>
    %83 = vector.shape_cast %82 : vector<1x1x64xf32> to vector<64xf32>
    %84 = vector.shape_cast %83 : vector<64xf32> to vector<1x64xf32>
    %85 = vector.broadcast %84 : vector<1x64xf32> to vector<16x64xf32>
    %86 = arith.mulf %36, %85 : vector<16x64xf32>
    %87 = arith.addf %81, %86 : vector<16x64xf32>
    %c1_i32_33 = arith.constant 1 : i32
    %88 = tpu.dynamic_rotate %53 by %c1_i32_33 dim 0 : vector<16x64xf32>, i32 -> vector<16x64xf32>
    %cst_34 = arith.constant 0.000000e+00 : f32
    %89 = vector.shape_cast %24 : vector<16x1xi1> to vector<16x1xi1>
    %90 = vector.broadcast %89 : vector<16x1xi1> to vector<16x64xi1>
    %91 = vector.broadcast %cst_34 : f32 to vector<16x64xf32>
    %92 = arith.select %90, %88, %91 : vector<16x64xi1>, vector<16x64xf32>
    %c15_i32_35 = arith.constant 15 : i32
    %93 = tpu.dynamic_rotate %87 by %c15_i32_35 dim 0 : vector<16x64xf32>, i32 -> vector<16x64xf32>
    %cst_36 = arith.constant 0.000000e+00 : f32
    %94 = vector.shape_cast %26 : vector<16x1xi1> to vector<16x1xi1>
    %95 = vector.broadcast %94 : vector<16x1xi1> to vector<16x64xi1>
    %96 = vector.broadcast %cst_36 : f32 to vector<16x64xf32>
    %97 = arith.select %95, %93, %96 : vector<16x64xi1>, vector<16x64xf32>
    %98 = arith.addf %92, %70 : vector<16x64xf32>
    %99 = arith.addf %98, %97 : vector<16x64xf32>
    %c0_37 = arith.constant 0 : index
    %c0_38 = arith.constant 0 : index
    %100 = vector.load %arg3[%c0_37, %c0_38] : memref<1x64xf32, #tpu.memory_space<vmem>>, vector<1x64xf32>
    %101 = vector.shape_cast %100 : vector<1x64xf32> to vector<64xf32>
    %102 = vector.shape_cast %101 : vector<64xf32> to vector<1x64xf32>
    %103 = vector.broadcast %102 : vector<1x64xf32> to vector<16x64xf32>
    %104 = arith.addf %99, %103 : vector<16x64xf32>
    %105 = arith.negf %104 : vector<16x64xf32>
    %106 = math.exp %105 : vector<16x64xf32>
    %cst_39 = arith.constant 1.000000e+00 : f32
    %107 = vector.broadcast %cst_39 : f32 to vector<16x64xf32>
    %108 = arith.addf %107, %106 : vector<16x64xf32>
    %109 = arith.divf %107, %108 : vector<16x64xf32>
    %110 = arith.mulf %104, %109 : vector<16x64xf32>
    %111 = vector.shape_cast %110 : vector<16x64xf32> to vector<1x16x64xf32>
    %cst_40 = arith.constant dense<0.000000e+00> : vector<1x64xf32>
    %112 = vector.multi_reduction <add>, %111, %cst_40 [1] : vector<1x16x64xf32> to vector<1x64xf32>
    %113 = vector.shape_cast %112 : vector<1x64xf32> to vector<1x16x4xf32>
    %cst_41 = arith.constant dense<0.000000e+00> : vector<1x4xf32>
    %114 = vector.multi_reduction <add>, %113, %cst_41 [1] : vector<1x16x4xf32> to vector<1x4xf32>
    %cst_42 = arith.constant 3.906250e-03 : f32
    %115 = vector.broadcast %cst_42 : f32 to vector<1x4xf32>
    %116 = arith.mulf %114, %115 : vector<1x4xf32>
    %117 = vector.shape_cast %116 : vector<1x4xf32> to vector<1x4x1xf32>
    %c0_43 = arith.constant 0 : index
    %c0_44 = arith.constant 0 : index
    %118 = vector.load %arg4[%c0_43, %c0_44] : memref<4x1xf32, #tpu.memory_space<vmem>>, vector<4x1xf32>
    %119 = vector.shape_cast %118 : vector<4x1xf32> to vector<1x4x1xf32>
    %120 = arith.mulf %117, %119 : vector<1x4x1xf32>
    %cst_45 = arith.constant dense<0.000000e+00> : vector<1x1xf32>
    %121 = vector.multi_reduction <add>, %120, %cst_45 [1] : vector<1x4x1xf32> to vector<1x1xf32>
    %c0_46 = arith.constant 0 : index
    %c0_47 = arith.constant 0 : index
    %122 = vector.load %arg5[%c0_46, %c0_47] : memref<1x1xf32, #tpu.memory_space<vmem>>, vector<1x1xf32>
    %123 = vector.shape_cast %122 : vector<1x1xf32> to vector<1xf32>
    %124 = vector.shape_cast %123 : vector<1xf32> to vector<1x1xf32>
    %125 = arith.addf %121, %124 : vector<1x1xf32>
    %126 = arith.negf %125 : vector<1x1xf32>
    %127 = math.exp %126 : vector<1x1xf32>
    %cst_48 = arith.constant 1.000000e+00 : f32
    %128 = vector.broadcast %cst_48 : f32 to vector<1x1xf32>
    %129 = arith.addf %128, %127 : vector<1x1xf32>
    %130 = arith.divf %128, %129 : vector<1x1xf32>
    %131 = arith.mulf %125, %130 : vector<1x1xf32>
    %132 = vector.shape_cast %131 : vector<1x1xf32> to vector<1x1x1xf32>
    %c0_49 = arith.constant 0 : index
    %c0_50 = arith.constant 0 : index
    %133 = vector.load %arg6[%c0_49, %c0_50] : memref<1x4xf32, #tpu.memory_space<vmem>>, vector<1x4xf32>
    %134 = vector.shape_cast %133 : vector<1x4xf32> to vector<1x1x4xf32>
    %135 = vector.broadcast %132 : vector<1x1x1xf32> to vector<1x1x4xf32>
    %136 = arith.mulf %135, %134 : vector<1x1x4xf32>
    %cst_51 = arith.constant dense<0.000000e+00> : vector<1x4xf32>
    %137 = vector.multi_reduction <add>, %136, %cst_51 [1] : vector<1x1x4xf32> to vector<1x4xf32>
    %c0_52 = arith.constant 0 : index
    %c0_53 = arith.constant 0 : index
    %138 = vector.load %arg7[%c0_52, %c0_53] : memref<1x4xf32, #tpu.memory_space<vmem>>, vector<1x4xf32>
    %139 = vector.shape_cast %138 : vector<1x4xf32> to vector<4xf32>
    %140 = vector.shape_cast %139 : vector<4xf32> to vector<1x4xf32>
    %141 = arith.addf %137, %140 : vector<1x4xf32>
    %142 = arith.negf %141 : vector<1x4xf32>
    %143 = math.exp %142 : vector<1x4xf32>
    %cst_54 = arith.constant 1.000000e+00 : f32
    %144 = vector.broadcast %cst_54 : f32 to vector<1x4xf32>
    %145 = arith.addf %144, %143 : vector<1x4xf32>
    %146 = arith.divf %144, %145 : vector<1x4xf32>
    %147 = tpu.concatenate %146, %146, %146, %146, %146, %146, %146, %146, %146, %146, %146, %146, %146, %146, %146, %146 in 1 : vector<1x4xf32>, vector<1x4xf32>, vector<1x4xf32>, vector<1x4xf32>, vector<1x4xf32>, vector<1x4xf32>, vector<1x4xf32>, vector<1x4xf32>, vector<1x4xf32>, vector<1x4xf32>, vector<1x4xf32>, vector<1x4xf32>, vector<1x4xf32>, vector<1x4xf32>, vector<1x4xf32>, vector<1x4xf32> -> vector<1x64xf32>
    %148 = vector.shape_cast %147 : vector<1x64xf32> to vector<1x1x64xf32>
    %149 = vector.broadcast %148 : vector<1x1x64xf32> to vector<1x16x64xf32>
    %150 = arith.mulf %111, %149 : vector<1x16x64xf32>
    %151 = vector.shape_cast %150 : vector<1x16x64xf32> to vector<16x64xf32>
    %c0_55 = arith.constant 0 : index
    %c0_56 = arith.constant 0 : index
    %152 = vector.load %arg8[%c0_55, %c0_56] : memref<64x64xf32, #tpu.memory_space<vmem>>, vector<64x64xf32>
    %cst_57 = arith.constant dense<0.000000e+00> : vector<16x64xf32>
    %153 = tpu.matmul %151, %152, %cst_57 {dimension_numbers = #tpu.dot_dimension_numbers<[1], [0], [0], [1], [0, 0, 1, 1], [], []>} : vector<16x64xf32>, vector<64x64xf32>, vector<16x64xf32> -> vector<16x64xf32>
    %c0_58 = arith.constant 0 : index
    %c0_59 = arith.constant 0 : index
    %154 = vector.load %arg9[%c0_58, %c0_59] : memref<1x64xf32, #tpu.memory_space<vmem>>, vector<1x64xf32>
    %155 = vector.shape_cast %154 : vector<1x64xf32> to vector<64xf32>
    %156 = vector.shape_cast %155 : vector<64xf32> to vector<1x64xf32>
    %157 = vector.broadcast %156 : vector<1x64xf32> to vector<16x64xf32>
    %158 = arith.addf %153, %157 : vector<16x64xf32>
    %159 = arith.addf %158, %0 : vector<16x64xf32>
    %c0_60 = arith.constant 0 : index
    %c0_61 = arith.constant 0 : index
    %160 = vector.load %arg10[%c0_60, %c0_61] : memref<16x64xf32, #tpu.memory_space<vmem>>, vector<16x64xf32>
    tpu.vector_store %arg10[%c0_60, %c0_61], %159 {strides = array<i32>} : memref<16x64xf32, #tpu.memory_space<vmem>>, vector<16x64xf32>,
    return
  }
  func.func @transform_0(%arg0: i32) -> (i32, i32) {
    %c0_i32 = arith.constant 0 : i32
    %c0_i32_0 = arith.constant 0 : i32
    return %arg0, %c0_i32 : i32, i32
  }
  func.func @transform_1(%arg0: i32) -> (i32, i32, i32) {
    %c0_i32 = arith.constant 0 : i32
    %c0_i32_0 = arith.constant 0 : i32
    %c0_i32_1 = arith.constant 0 : i32
    %c0_i32_2 = arith.constant 0 : i32
    return %c0_i32, %c0_i32_0, %c0_i32_1 : i32, i32, i32
  }
  func.func @transform_2(%arg0: i32) -> (i32, i32) {
    %c0_i32 = arith.constant 0 : i32
    %c0_i32_0 = arith.constant 0 : i32
    %c0_i32_1 = arith.constant 0 : i32
    return %c0_i32, %c0_i32_0 : i32, i32
  }
  func.func @transform_3(%arg0: i32) -> (i32, i32) {
    %c0_i32 = arith.constant 0 : i32
    %c0_i32_0 = arith.constant 0 : i32
    %c0_i32_1 = arith.constant 0 : i32
    return %c0_i32, %c0_i32_0 : i32, i32
  }
  func.func @transform_4(%arg0: i32) -> (i32, i32) {
    %c0_i32 = arith.constant 0 : i32
    %c0_i32_0 = arith.constant 0 : i32
    %c0_i32_1 = arith.constant 0 : i32
    return %c0_i32, %c0_i32_0 : i32, i32
  }
  func.func @transform_5(%arg0: i32) -> (i32, i32) {
    %c0_i32 = arith.constant 0 : i32
    %c0_i32_0 = arith.constant 0 : i32
    %c0_i32_1 = arith.constant 0 : i32
    return %c0_i32, %c0_i32_0 : i32, i32
  }
  func.func @transform_6(%arg0: i32) -> (i32, i32) {
    %c0_i32 = arith.constant 0 : i32
    %c0_i32_0 = arith.constant 0 : i32
    %c0_i32_1 = arith.constant 0 : i32
    return %c0_i32, %c0_i32_0 : i32, i32
  }
  func.func @transform_7(%arg0: i32) -> (i32, i32) {
    %c0_i32 = arith.constant 0 : i32
    %c0_i32_0 = arith.constant 0 : i32
    %c0_i32_1 = arith.constant 0 : i32
    return %c0_i32, %c0_i32_0 : i32, i32
  }
  func.func @transform_8(%arg0: i32) -> (i32, i32) {
    %c0_i32 = arith.constant 0 : i32
    %c0_i32_0 = arith.constant 0 : i32
    %c0_i32_1 = arith.constant 0 : i32
    return %c0_i32, %c0_i32_0 : i32, i32
  }
  func.func @transform_9(%arg0: i32) -> (i32, i32) {
    %c0_i32 = arith.constant 0 : i32
    %c0_i32_0 = arith.constant 0 : i32
    return %arg0, %c0_i32 : i32, i32
  }
}

</mosaic_0001>

<bundles_post_ra>
// kernel: tpu_custom_call.1
= control target key start
LH: loop header
LB: loop body
LE: loop exit
PB: predicated region body
PF: predicated region fallthrough
CT: control target
= control target key end

     0   :  { %s1792_s0 = inlined_call_operand.hbm [shape: f32[32,64], index: 0, kind: input, shape index: {}]   ;;  %s1793_s1 = inlined_call_operand.vmem [shape: f32[3,3,64], index: 1, kind: input, shape index: {}]   ;;  %s1794_s2 = inlined_call_operand.vmem [shape: f32[1,64], index: 2, kind: input, shape index: {}]   ;;  %s1795_s3 = inlined_call_operand.vmem [shape: f32[4,1], index: 3, kind: input, shape index: {}]   ;;  %s1796_s4 = inlined_call_operand.<no memory space> [shape: f32[1,1], index: 4, kind: input, shape index: {}]   ;;  %s1797_s5 = inlined_call_operand.vmem [shape: f32[1,4], index: 5, kind: input, shape index: {}]   ;;  %s1798_s6 = inlined_call_operand.vmem [shape: f32[1,4], index: 6, kind: input, shape index: {}]   ;;  %s1799_s7 = inlined_call_operand.hbm [shape: f32[64,64], index: 7, kind: input, shape index: {}]   ;;  %s1800_s8 = inlined_call_operand.vmem [shape: f32[1,64], index: 8, kind: input, shape index: {}]   ;;  %s1801_s9 = inlined_call_operand.hbm [shape: f32[32,64], index: 9, kind: output, shape index: {}]  }
   0x1   :  { %v14_v0 = vstv %s1796_s4 }
   0x2   :  { %15 = vst [vmem:[#allocation2] sm:$0x1] %v14_v0 }
   0x3   :  { %16 = vsyncpa [#allocation4], 0 }
   0x4   :  { %18 = vsyncpa [#allocation4 + $0x1], 0 }
   0x5   :  { %19 = vsyncpa [#allocation7], 0 }
   0x6   :  { %20 = vsyncpa [#allocation5], 0 }
   0x7   :  { %22 = vsyncpa [#allocation5 + $0x1], 0  ;;  %s1469_s11 = smov 0   ;;  %s1471_s12 = smov 0  }
   0x8   :  { %s1473_s13 = smov 0   ;;  %s1475_s14 = smov 0  }
   0x9 LB: > { %s1490_s4 = sadd.s32 4294967295, %s1374_s14   ;;  %s1049_s15 = sadd.s32 4294967294, %s1374_s14   ;;  %s1374_s14 = sphi %s1475_s14, %s1825_s14   ;;  %s1370_s13 = sphi %s1473_s13, %s1828_s13   ;;  %s1366_s12 = sphi %s1471_s12, %s1827_s12   ;;  %s1362_s11 = sphi %s1469_s11, %s1826_s11  }
   0xa   : > { %p48_p0 = scmp.ne.s32.totalorder %s1366_s12, %s1362_s11  ;;  %p1802_p1 = scmp.eq.s32.totalorder %s1490_s4, 0 }
   0xb   : > { %p246_p3 = scmp.eq.s32.totalorder %s1049_s15, 1  ;;  %p1050_p5 = scmp.ge.s32.totalorder %s1374_s14, 1 }
   0xc   : > { %p1499_p4 = por %p1802_p1, %p48_p0  ;;  %p253_p7 = scmp.lt.s32.totalorder %s1374_s14, 3 }
   0xd   : > { %p1504_p6 = por %p246_p3, %p48_p0  ;;  %s1376_s19 = smov [#allocation6]  }
   0xe   : > { %s1808_s16 = scalar_select %p1499_p4, 1, 0 }
   0xf   : > { %s1809_s17 = scalar_select %p1504_p6, 1, 0 }
  0x10   : > { %p1509_p8 = pnand %p1050_p5, %p253_p7  ;;  %s283_s20 = sshll.u32 %s1376_s19, 4  ;;  %s1513_s20 = int_to_ptr.vmem [resolvable:$true] %s283_s20 }
  0x11   : > { %s1525_s22 = sadd.s32 1, %s1374_s14   ;;  %s35_s23 = sadd.s32 1, %s1370_s13 }
  0x12   : > { %s1810_s18 = scalar_select %p1509_p8, 1, 0 }
  0x13   : > { %p1143_p9 = pneg %p1509_p8  ;;  %1812 = sst [smem:[#allocation12_spill]] %s1525_s22 }
  0x14   : > { %s32_s24 = ssub.s32 %s1374_s14, %s1525_s22  ;;  %s1246_s27 = scalar_lea.hbm %s1799_s7, 1024 }
  0x15   : > { %p1520_p11 = pnand %p1143_p9, %p1802_p1  ;;  %p1247_p12 = scmp.ne.s32.totalorder %s1799_s7, %s1246_s27 }
  0x16   : > { %p1253_p5 = scmp.lt.u32.totalorder %s1246_s27, %s1799_s7 }
  0x17   : > { %p1248_p13 = pneg %p1520_p11 }
  0x19   : > { %p1249_p0 = pnand %p1248_p13, %p1247_p12 }
  0x1b   : > { %p1250_p3 = pneg %p1249_p0 }
  0x1d   : > { %p1255_p7 = pnand %p1253_p5, %p1250_p3 }
  0x1f   : > { %1258 = shalt.err (!%p1255_p7)
}
  0x20   : > { %s1259_s15 = scalar_lea.vmem %s1513_s20, 1024  ;;  %p1267_p2 = scmp.lt.s32.totalorder %s1513_s20, %s1513_s20 }
  0x21   : > { %p1260_p9 = scmp.ne.s32.totalorder %s1513_s20, %s1259_s15  ;;  %p1268_p6 = scmp.lt.s32.totalorder %s1259_s15, %s1259_s15 }
  0x23   : > { %p1262_p10 = pnand %p1260_p9, %p1248_p13  ;;  %p1269_p4 = por %p1268_p6, %p1267_p2 }
  0x25   : > { %p1263_p1 = pneg %p1262_p10 }
  0x27   : > { %p1270_p8 = pnand %p1269_p4, %p1263_p1 }
  0x29   : > { %1273 = shalt.err (!%p1270_p8)
}
  0x2a   : > { %s1807_s19 = smov 128   ;;  %s1378_s25 = smov 8  }
  0x2b   : > { %1146 = dma.hbm_to_vmem [thread:$0]  (!%p1520_p11), %s1799_s7, 1024, %s1513_s20, [#allocation7], %s1807_s19, %s1807_s19, %s1378_s25  }
  0x2c   : > { %p33_p1 = scmp.eq.s32.totalorder %s32_s24, 0  ;;  %p42_p2 = scmp.ne.s32.totalorder %s1370_s13, %s1366_s12 }
  0x2d   : > { %p43_p4 = scmp.eq.s32.totalorder %s1374_s14, 0  ;;  %p1156_p6 = scmp.lt.s32.totalorder %s1374_s14, 2 }
  0x2e   : > { %s1559_s28 = scalar_select %p33_p1, %s1370_s13, %s35_s23  }
  0x2f   : > { %p44_p8 = por %p43_p4, %p42_p2  ;;  %p1813_p10 = scmp.eq.s32.totalorder %s1490_s4, 1 }
  0x30   : > { %s300_s21 = sand.u32 1, %s1370_s13   ;;  %s1088_s30 = sshll.u32 %s1374_s14, 8 }
  0x31   : > { %p1563_p12 = por %p1813_p10, %p42_p2  ;;  %s1053_s10 = sshll.u32 %s300_s21, 4 }
  0x32   : > { %s1572_s26 = scalar_lea.hbm %s1792_s0, %s1088_s30  ;;  %s304_s20 = scalar_lea.vmem [#allocation3], %s1053_s10 }
  0x33   : > { %s311_s23 = sshll.u32 %s304_s20, 4  ;;  %p1574_p11 = pnand %p1156_p6, %p44_p8  ;;  %s1578_s23 = int_to_ptr.vmem [resolvable:$true] %s311_s23 }
  0x34   : > { %s1580_s27 = scalar_lea.sflag [#allocation4], %s300_s21  ;;  %s1274_s19 = scalar_lea.hbm %s1572_s26, 256 }
  0x35   : > { %p1275_p13 = scmp.ne.s32.totalorder %s1572_s26, %s1274_s19  ;;  %p1276_p0 = pneg %p1574_p11 }
  0x36   : > { %s1279_s10 = scalar_lea.hbm %s1792_s0, 512  ;;  %p1280_p7 = scmp.lt.u32.totalorder %s1572_s26, %s1792_s0 }
  0x37   : > { %p1277_p3 = pnand %p1276_p0, %p1275_p13  ;;  %p1281_p9 = scmp.lt.u32.totalorder %s1279_s10, %s1274_s19 }
  0x38   : > { %p1283_p2 = scmp.lt.u32.totalorder %s1274_s19, %s1572_s26 }
  0x39   : > { %p1278_p5 = pneg %p1277_p3  ;;  %p1282_p1 = por %p1281_p9, %p1280_p7 }
  0x3b   : > { %p1284_p4 = por %p1283_p2, %p1282_p1 }
  0x3d   : > { %p1285_p6 = pnand %p1284_p4, %p1278_p5 }
  0x3f   : > { %1288 = shalt.err (!%p1285_p6)
}
  0x40   : > { %s1289_s21 = scalar_lea.vmem %s1578_s23, 256  ;;  %s1379_s22 = smov [#allocation3]  }
  0x41   : > { %p1290_p8 = scmp.ne.s32.totalorder %s1578_s23, %s1289_s21  ;;  %s1294_s30 = sshll.u32 %s1379_s22, 4  ;;  %s1295_s30 = int_to_ptr.vmem [resolvable:$false] %s1294_s30 }
  0x42   : > { %s1296_s15 = scalar_lea.vmem %s1295_s30, 512  ;;  %p1297_p3 = scmp.lt.s32.totalorder %s1578_s23, %s1295_s30 }
  0x43   : > { %p1292_p10 = pnand %p1290_p8, %p1276_p0  ;;  %p1298_p7 = scmp.lt.s32.totalorder %s1296_s15, %s1289_s21 }
  0x45   : > { %p1293_p13 = pneg %p1292_p10  ;;  %p1299_p9 = por %p1298_p7, %p1297_p3 }
  0x47   : > { %p1300_p1 = pnand %p1299_p9, %p1293_p13 }
  0x49   : > { %1303 = shalt.err (!%p1300_p1)
}
  0x4a   : > { %s1816_s19 = smov 128   ;;  %p1817_p0 = scmp.ne.s32.totalorder %s1810_s18, 0 }
  0x4b   : > { %1150 = dma.hbm_to_vmem [thread:$0]  (!%p1574_p11), %s1572_s26, 256, %s1578_s23, %s1580_s27, %s1816_s19, %s1816_s19, %s1378_s25  }
  0x4c   : > { %323 = sbr.rel (%p1817_p0) target bundleno = 1371 (0x55b), region = 56  ;;  %s1614_s10 = sand.u32 (!%p1817_p0), 1, %s1366_s12  }
  0x4d   : > { %s1057_s20 = sshll.u32 (!%p1817_p0), %s1614_s10, 4  ;;  %s326_s21 = scalar_lea.sflag (!%p1817_p0), [#allocation4], %s1614_s10 }
  0x4e   : > { %s329_s24 = scalar_lea.vmem (!%p1817_p0), [#allocation3], %s1057_s20  ;;  %p1818_p5 = scmp.ne.s32.totalorder (!%p1817_p0), %s1808_s16, 0 }
  0x53   : > { %1349 = dma.done.wait (%p1818_p5), %s326_s21, 256  }
  0x54   : > { %1351 = vsyncadd (%p1818_p5), %s326_s21, 4294967040  ;;  %p1819_p11 = scmp.eq.s32.totalorder %s1490_s4, 0 }
  0x56   : > { %1353 = dma.done.wait (%p1819_p11), [#allocation7], 1024   ;;  %p1820_p2 = pmov %p1819_p11 }
  0x57   : > { %v1628_v1 = vld [vmem:[%s329_s24] sm:$0xff]  ;;  %s1380_s18 = smov 64   ;;  %v1631_v2 = vld [vmem:[%s329_s24 + $0x8] sm:$0xff]  ;;  %vm407_vm0 = vcmask 1048064   ;;  %s1381_s16 = smov 68   ;;  %v372_v11 = vlaneseq  ;;  %vm568_vm7 = vcmask 523264  }
  0x58   : > { %1355 = vsyncadd (%p1820_p2), [#allocation7], 4294966272  ;;  %408 = vrot.lane.b32.xlu0 %v1628_v1, %s1380_s18  ;;  %s1382_s25 = smov 124   ;;  %v1060_v14 = vld [vmem:[%s1793_s1] ss:$0 sm:$0xff]  ;;  %s1383_s26 = smov 120  }
  0x59   : > { %v373_v12 = vand.u32 127, %v372_v11  ;;  %v1642_v13 = vshrl.u32 %v372_v11, 7  ;;  %v1061_v15 = vld [vmem:[%s1793_s1 + $0x1] ss:$0 sm:$0xff]  ;;  %v1070_v17 = vld [vmem:[%s1793_s1 + $0x8] ss:$0 sm:$0xff] }
  0x5a   : > { %v1072_v18 = vld [vmem:[%s1793_s1 + $0x9] ss:$0 sm:$0xff]  ;;  %v454_v20 = vmul.f32 %v1061_v15, %v1628_v1  ;;  %v1062_v21 = vld [vmem:[%s1793_s1 + $0x2] ss:$0 sm:$0xff]  ;;  %v1066_v22 = vld [vmem:[%s1793_s1 + $0x5] ss:$0 sm:$0xff]  ;;  %v455_v31 = vmul.f32 %v1061_v15, %v1631_v2 }
  0x5b   : > { %vm374_vm1 = vcmp.ge.s32.totalorder %v373_v12, 4  ;;  %vm375_vm2 = vcmp.lt.s32.totalorder %v373_v12, 60  ;;  %v506_v25 = vmul.f32 %v1072_v18, %v1628_v1  ;;  %v1074_v27 = vld [vmem:[%s1793_s1 + $0xa] ss:$0 sm:$0xff]  ;;  %v378_v29 = vadd.s32 8, %v1642_v13  ;;  %s1384_s23 = smov 112  }
  0x5c   : > { %411 = vrot.lane.b32.xlu0 %v1631_v2, %s1380_s18  ;;  %v1064_v30 = vld [vmem:[%s1793_s1 + $0x4] ss:$0 sm:$0xff]  ;;  %v507_v32 = vmul.f32 %v1072_v18, %v1631_v2  ;;  %v480_v38 = vmul.f32 %v1066_v22, %v1628_v1  ;;  %v481_v39 = vmul.f32 %v1066_v22, %v1631_v2  ;;  %v383_v41 = vand.u32 15, %v1642_v13  ;;  %v1068_v50 = vld [vmem:[%s1793_s1 + $0x6] ss:$0 sm:$0xff]  ;;  %s1385_s27 = smov 116  }
  0x5d   : > { %v390_v45 = vand.u32 15, %v378_v29  ;;  %vm521_vm3 = vcmp.lt.s32.totalorder %v1642_v13, 1  ;;  %vm532_vm4 = vcmp.lt.s32.totalorder %v1642_v13, 7  ;;  %s1386_s22 = smov 104   ;;  %s1387_s30 = smov 108   ;;  %vm722_vm8 = vcmask 31744  }
  0x5e   : > { %vm403_vm5 = vcmp.gt.s32.totalorder %v383_v41, 0  ;;  %s1388_s15 = smov 96   ;;  %s1389_s19 = smov 100   ;;  %vm738_vm9 = vcmask 3072   ;;  %vm818_vm10 = vcmask 64512   ;;  %vm820_vm11 = vcmask 97280  }
  0x5f   : > { %vm1685_vm6 = vcmp.lt.s32.totalorder %v390_v45, 15  ;;  %s1390_s21 = smov 88   ;;  %s1391_s24 = smov 92   ;;  %vm822_vm12 = vcmask 130048   ;;  %vm824_vm13 = vcmask 162816   ;;  %vm826_vm14 = vcmask 195584  }
  0x60   : > { %vm828_vm15 = vcmask 228352  }
  0xca   : > { %v409_v3 = vpop.permute.xlu0 %408 }
  0xcb   : > { %v410_v4 = vsel %vm407_vm0, %v409_v3, %v1628_v1 }
  0xcc   : > { %414 = vrot.lane.b32.xlu1 %v410_v4, %s1380_s18 }
  0xce   : > { %v412_v5 = vpop.permute.xlu0 %411 }
  0xcf   : > { %v413_v6 = vsel %vm407_vm0, %v412_v5, %v1631_v2 }
  0xd0   : > { %416 = vrot.lane.b32.xlu1 %v413_v6, %s1380_s18  ;;  %s1392_s18 = smov 80  }
 0x13e   : > { %v415_v7 = vpop.permute.xlu1 %414 }
 0x13f   : > { %v418_v8 = vsel %vm407_vm0, %v415_v7, %v1628_v1 }
 0x140   : > { %424 = vrot.lane.b32.xlu0 %v418_v8, %s1381_s16 }
 0x142   : > { %v417_v9 = vpop.permute.xlu1 %416 }
 0x143   : > { %v419_v10 = vsel %vm407_vm0, %v417_v9, %v1631_v2  ;;  %vm830_vm0 = vcmask 261120  }
 0x144   : > { %434 = vrot.lane.b32.xlu0 %v418_v8, %s1382_s25  ;;  %426 = vrot.lane.b32.xlu1 %v419_v10, %s1381_s16 }
 0x148   : > { %436 = vrot.lane.b32.xlu1 %v419_v10, %s1382_s25 }
 0x1b2   : > { %v425_v16 = vpop.permute.xlu0 %424 }
 0x1b3   : > { %v430_v19 = vsel %vm374_vm1, %v425_v16, 0.0 }
 0x1b4   : > { %v447_v23 = vmul.f32 %v1060_v14, %v430_v19  ;;  %v499_v24 = vmul.f32 %v1070_v17, %v430_v19  ;;  %v473_v43 = vmul.f32 %v1064_v30, %v430_v19 }
 0x1b6   : > { %v427_v26 = vpop.permute.xlu1 %426  ;;  %v435_v28 = vpop.permute.xlu0 %434  ;;  %v456_v42 = vadd.f32 %v454_v20, %v447_v23  ;;  %v508_v44 = vadd.f32 %v506_v25, %v499_v24  ;;  %v482_v60 = vadd.f32 %v480_v38, %v473_v43 }
 0x1b7   : > { %v431_v33 = vsel %vm374_vm1, %v427_v26, 0.0  ;;  %v440_v34 = vsel %vm375_vm2, %v435_v28, 0.0  ;;  %vm832_vm1 = vcmask 293888  }
 0x1b8   : > { %v448_v35 = vmul.f32 %v1060_v14, %v431_v33  ;;  %v500_v36 = vmul.f32 %v1070_v17, %v431_v33  ;;  %v463_v37 = vmul.f32 %v1062_v21, %v440_v34  ;;  %v515_v40 = vmul.f32 %v1074_v27, %v440_v34  ;;  %v1075_v14 = vld [vmem:[%s1794_s2] ss:$0 sm:$0xff] }
 0x1b9   : > { %v474_v48 = vmul.f32 %v1064_v30, %v431_v33  ;;  %v489_v57 = vmul.f32 %v1068_v50, %v440_v34 }
 0x1ba   : > { %v437_v46 = vpop.permute.xlu1 %436  ;;  %v457_v47 = vadd.f32 %v455_v31, %v448_v35  ;;  %v509_v49 = vadd.f32 %v507_v32, %v500_v36  ;;  %v465_v52 = vadd.f32 %v463_v37, %v456_v42  ;;  %v517_v53 = vadd.f32 %v515_v40, %v508_v44 }
 0x1bb   : > { %v441_v51 = vsel %vm375_vm2, %v437_v46, 0.0  ;;  %v483_v61 = vadd.f32 %v481_v39, %v474_v48  ;;  %v491_v6 = vadd.f32 %v489_v57, %v482_v60  ;;  %v1396_v48 = vmov 1983009808  }
 0x1bc   : > { %v464_v54 = vmul.f32 %v1062_v21, %v441_v51  ;;  %v516_v55 = vmul.f32 %v1074_v27, %v441_v51  ;;  %v490_v56 = vmul.f32 %v1068_v50, %v441_v51  ;;  %v519_v63 = vrot.slane %v465_v52, 7 }
 0x1bd   : > { %v530_v0 = vrot.slane %v517_v53, 1  ;;  %v1397_v57 = vmov 1934713408   ;;  %vm834_vm2 = vcmask 326656  }
 0x1be   : > { %v466_v58 = vadd.f32 %v464_v54, %v457_v47  ;;  %v518_v59 = vadd.f32 %v516_v55, %v509_v49  ;;  %v492_v5 = vadd.f32 %v490_v56, %v483_v61  ;;  %v626_v49 = vunpack.c.l.s4 %v1396_v48 }
 0x1c0   : > { %v520_v3 = vrot.slane %v466_v58, 7  ;;  %v531_v4 = vrot.slane %v518_v59, 1  ;;  %v627_v52 = vunpack.c.0.s8 %v626_v49  ;;  %v658_v58 = vunpack.c.l.s4 %v1397_v57 }
 0x1c2   : > { %v522_v7 = vsel %vm521_vm3, %v519_v63, %v520_v3  ;;  %v523_v8 = vsel %vm521_vm3, %v520_v3, %v519_v63  ;;  %v534_v9 = vsel %vm532_vm4, %v531_v4, %v530_v0  ;;  %v533_v16 = vsel %vm532_vm4, %v530_v0, %v531_v4 }
 0x1c3   : > { %v528_v10 = vsel %vm403_vm5, %v523_v8, 0.0  ;;  %v540_v11 = vsel %vm1685_vm6, %v534_v9, 0.0  ;;  %v542_v12 = vadd.f32 %v522_v7, %v492_v5  ;;  %v630_v56 = vsub.s32 %v627_v52, %v1642_v13 }
 0x1c4   : > { %v541_v15 = vadd.f32 %v528_v10, %v491_v6  ;;  %v659_v4 = vunpack.c.0.s8 %v658_v58  ;;  %v755_v58 = vld [vmem:[%s1797_s5] sm:$0x1]  ;;  %vm836_vm3 = vcmask 359424   ;;  %vm838_vm4 = vcmask 392192  }
 0x1c5   : > { %v544_v17 = vadd.f32 %v542_v12, %v540_v11  ;;  %vm840_vm5 = vcmask 424960   ;;  %vm842_vm6 = vcmask 457728  }
 0x1c6   : > { %v543_v18 = vadd.f32 %v541_v15, %v533_v16 }
 0x1c7   : > { %v553_v19 = vadd.f32 %v1075_v14, %v544_v17 }
 0x1c8   : > { %v552_v20 = vadd.f32 %v1075_v14, %v543_v18  ;;  %v662_v14 = vsub.s32 %v659_v4, %v1642_v13 }
 0x1c9   : > { %v1077_v21 = vmul.f32 -1.442695, %v553_v19 }
 0x1ca   : > { %v1076_v22 = vmul.f32 -1.442695, %v552_v20 }
 0x1cb   : > { %1230 = vpow2.f32 %v1077_v21 }
 0x1cc   : > { %1232 = vpow2.f32 %v1076_v22 }
 0x1d5   : > { %v1231_v23 = vpop.eup %1230 }
 0x1d6   : > { %v1233_v24 = vpop.eup %1232  ;;  %v561_v25 = vadd.f32 1.0, %v1231_v23 }
 0x1d7   : > { %v560_v26 = vadd.f32 1.0, %v1233_v24 }
 0x1d8   : > { %1234 = vrcp.f32 %v561_v25 }
 0x1d9   : > { %1236 = vrcp.f32 %v560_v26 }
 0x1e2   : > { %v1235_v27 = vpop.eup %1234 }
 0x1e3   : > { %v1237_v28 = vpop.eup %1236  ;;  %v1702_v29 = vmul.f32 %v1235_v27, %v553_v19 }
 0x1e4   : > { %v1704_v30 = vmul.f32 %v1237_v28, %v552_v20 }
 0x1e5   : > { %v570_v31 = vsel %vm568_vm7, %v1702_v29, 0.0 }
 0x1e6   : > { %v569_v32 = vsel %vm568_vm7, %v1704_v30, 0.0 }
 0x1e7   : > { %v571_v33 = vadd.f32 %v570_v31, %v569_v32 }
 0x1e9   : > { %v572_v34 = vrot.slane %v571_v33, 4 }
 0x1eb   : > { %v573_v35 = vadd.f32 %v572_v34, %v571_v33 }
 0x1ed   : > { %v574_v36 = vrot.slane %v573_v35, 2 }
 0x1ef   : > { %v575_v37 = vadd.f32 %v574_v36, %v573_v35 }
 0x1f1   : > { %v576_v38 = vrot.slane %v575_v37, 1 }
 0x1f3   : > { %v577_v39 = vadd.f32 %v576_v38, %v575_v37 }
 0x1f5   : > { %582 = vrot.lane.b32.xlu1 %v577_v39, %s1383_s26  ;;  %579 = vrot.lane.b32.xlu0 %v577_v39, %s1382_s25  ;;  %s1393_s26 = smov 84   ;;  %s1394_s25 = smov 72  }
 0x1f9   : > { %588 = vrot.lane.b32.xlu1 %v577_v39, %s1384_s23  ;;  %585 = vrot.lane.b32.xlu0 %v577_v39, %s1385_s27  ;;  %s1395_s23 = smov 76   ;;  %s1406_s27 = smov 24  }
 0x1fd   : > { %594 = vrot.lane.b32.xlu1 %v577_v39, %s1386_s22  ;;  %591 = vrot.lane.b32.xlu0 %v577_v39, %s1387_s30  ;;  %s1407_s22 = smov 44   ;;  %s1408_s30 = smov 32  }
 0x201   : > { %600 = vrot.lane.b32.xlu1 %v577_v39, %s1388_s15  ;;  %597 = vrot.lane.b32.xlu0 %v577_v39, %s1389_s19  ;;  %s1409_s15 = smov 52   ;;  %s1410_s19 = smov 40  }
 0x205   : > { %606 = vrot.lane.b32.xlu1 %v577_v39, %s1390_s21  ;;  %603 = vrot.lane.b32.xlu0 %v577_v39, %s1391_s24  ;;  %s1399_s21 = smov 12   ;;  %s1400_s24 = smov 4  }
 0x209   : > { %612 = vrot.lane.b32.xlu1 %v577_v39, %s1392_s18  ;;  %609 = vrot.lane.b32.xlu0 %v577_v39, %s1393_s26  ;;  %s1401_s18 = smov 20   ;;  %s1402_s26 = smov 8  }
 0x20d   : > { %618 = vrot.lane.b32.xlu1 %v577_v39, %s1394_s25  ;;  %615 = vrot.lane.b32.xlu0 %v577_v39, %s1395_s23  ;;  %s1403_s25 = smov 28   ;;  %s1404_s23 = smov 16  }
 0x211   : > { %621 = vrot.lane.b32.xlu0 %v577_v39, %s1381_s16  ;;  %s1405_s16 = smov 36  }
 0x267   : > { %v583_v40 = vpop.permute.xlu1 %582  ;;  %v580_v41 = vpop.permute.xlu0 %579 }
 0x268   : > { %v624_v61 = vcombine.low %v577_v39, %v583_v40  ;;  %v1398_v40 = vmov 0  }
 0x269   : > { %1229 = vset.pattern.permute.xlu0 %v1398_v40 }
 0x26a   : > { %v631_v8 = vrot.slane %v624_v61, %v630_v56 }
 0x26b   : > { %v589_v42 = vpop.permute.xlu1 %588  ;;  %v586_v43 = vpop.permute.xlu0 %585 }
 0x26c   : > { %v632_v59 = vcombine.low %v580_v41, %v586_v43  ;;  %v736_v41 = vld [vmem:[%s1795_s3] sm:$0xf] }
 0x26e   : > { %v639_v5 = vrot.slane %v632_v59, %v630_v56  ;;  %v763_v59 = vld [vmem:[%s1798_s6] sm:$0x1] }
 0x26f   : > { %v595_v44 = vpop.permute.xlu1 %594  ;;  %v592_v45 = vpop.permute.xlu0 %591 }
 0x270   : > { %v640_v60 = vcombine.low %v589_v42, %v595_v44  ;;  %v656_v15 = vcombine.low %v631_v8, %v639_v5  ;;  %v852_v5 = vld [vmem:[#allocation6] sm:$0xff]  ;;  %v854_v8 = vld [vmem:[#allocation6 + $0x10] sm:$0xff] }
 0x272   : > { %v647_v6 = vrot.slane %v640_v60, %v630_v56  ;;  %v663_v22 = vrot.slane %v656_v15, %v662_v14  ;;  %v858_v15 = vld [vmem:[#allocation6 + $0x30] sm:$0xff] }
 0x273   : > { %v601_v46 = vpop.permute.xlu1 %600  ;;  %v598_v47 = vpop.permute.xlu0 %597 }
 0x274   : > { %v648_v53 = vcombine.low %v592_v45, %v598_v47 }
 0x276   : > { %v655_v62 = vrot.slane %v648_v53, %v630_v56 }
 0x277   : > { %v607_v50 = vpop.permute.xlu1 %606  ;;  %v604_v51 = vpop.permute.xlu0 %603 }
 0x278   : > { %v673_v7 = vcombine.low %v601_v46, %v607_v50  ;;  %v664_v9 = vcombine.low %v647_v6, %v655_v62  ;;  %v746_v50 = vld [vmem:[#allocation2] sm:$0x1]  ;;  %v853_v6 = vld [vmem:[#allocation6 + $0x8] sm:$0xff] }
 0x27a   : > { %v680_v16 = vrot.slane %v673_v7, %v630_v56  ;;  %v671_v18 = vrot.slane %v664_v9, %v662_v14  ;;  %v1119_v7 = vpack.c.bf16 %v853_v6, %v852_v5  ;;  %v855_v9 = vld [vmem:[#allocation6 + $0x18] sm:$0xff] }
 0x27b   : > { %v613_v54 = vpop.permute.xlu1 %612  ;;  %v610_v55 = vpop.permute.xlu0 %609 }
 0x27c   : > { %v681_v63 = vcombine.low %v604_v51, %v610_v55  ;;  %v672_v24 = vcombine.low %v663_v22, %v671_v18  ;;  %1120 = vmatprep.subr.bf16.mxu0 %v1119_v7 }
 0x27d   : > { %1122 = vmatpush3.bf16.msra.mxu0 %v1119_v7 }
 0x27e   : > { %v688_v10 = vrot.slane %v681_v63, %v630_v56  ;;  %v723_v28 = vsel %vm722_vm8, %v672_v24, 0.0 }
 0x27f   : > { %v619_v0 = vpop.permute.xlu1 %618  ;;  %v616_v3 = vpop.permute.xlu0 %615 }
 0x280   : > { %v689_v11 = vcombine.low %v613_v54, %v619_v0  ;;  %v705_v19 = vcombine.low %v680_v16, %v688_v10  ;;  %v1123_v10 = vpack.c.bf16 %v855_v9, %v854_v8  ;;  %v859_v16 = vld [vmem:[#allocation6 + $0x38] sm:$0xff] }
 0x282   : > { %v696_v20 = vrot.slane %v689_v11, %v630_v56  ;;  %v712_v25 = vrot.slane %v705_v19, %v662_v14  ;;  %1124 = vmatprep.subr.bf16.mxu0 %v1123_v10  ;;  %v856_v11 = vld [vmem:[#allocation6 + $0x20] sm:$0xff] }
 0x283   : > { %v622_v12 = vpop.permute.xlu0 %621  ;;  %1126 = vmatpush3.bf16.msra.mxu0 %v1123_v10 }
 0x284   : > { %v697_v17 = vcombine.low %v616_v3, %v622_v12  ;;  %v857_v12 = vld [vmem:[#allocation6 + $0x28] sm:$0xff] }
 0x286   : > { %v704_v21 = vrot.slane %v697_v17, %v630_v56  ;;  %v1131_v17 = vpack.c.bf16 %v859_v16, %v858_v15 }
 0x288   : > { %v713_v23 = vcombine.low %v696_v20, %v704_v21 }
 0x28a   : > { %v720_v26 = vrot.slane %v713_v23, %v662_v14  ;;  %v1127_v14 = vpack.c.bf16 %v857_v12, %v856_v11 }
 0x28c   : > { %v721_v27 = vcombine.low %v712_v25, %v720_v26  ;;  %1128 = vmatprep.subr.bf16.mxu0 %v1127_v14 }
 0x28d   : > { %1130 = vmatpush3.bf16.msra.mxu0 %v1127_v14 }
 0x28e   : > { %v724_v31 = vsel %vm722_vm8, %v721_v27, 0.0  ;;  %1132 = vmatprep.subr.bf16.mxu0 %v1131_v17 }
 0x28f   : > { %v725_v32 = vadd.f32 %v724_v31, %v723_v28 }
 0x291   : > { %v726_v33 = vrot.slane %v725_v32, 4  ;;  %1134 = vmatpush3.bf16.msra.mxu0 %v1131_v17 }
 0x293   : > { %v727_v34 = vadd.f32 %v726_v33, %v725_v32 }
 0x295   : > { %v728_v35 = vrot.slane %v727_v34, 2 }
 0x297   : > { %v729_v36 = vadd.f32 %v728_v35, %v727_v34 }
 0x299   : > { %v730_v37 = vrot.slane %v729_v36, 1 }
 0x29b   : > { %v731_v38 = vadd.f32 %v730_v37, %v729_v36 }
 0x29d   : > { %v732_v39 = vmul.f32 0.00390625, %v731_v38 }
 0x29f   : > { %734 = vbcast.lane.b32.xlu1 %v732_v39, 256 }
 0x311   : > { %v735_v42 = vpop.permute.xlu1 %734 }
 0x312   : > { %v737_v43 = vmul.f32 %v736_v41, %v735_v42 }
 0x314   : > { %v739_v44 = vsel %vm738_vm9, %v737_v43, 0.0 }
 0x315   : > { %v740_v45 = vrot.slane %v739_v44, 4 }
 0x317   : > { %v741_v46 = vadd.f32 %v740_v45, %v739_v44  ;;  %v848_v45 = vsub.s32 0, %v1642_v13  ;;  %v1080_v13 = vld [vmem:[%s1800_s8] ss:$0 sm:$0xff] }
 0x319   : > { %v742_v47 = vrot.slane %v741_v46, 2 }
 0x31b   : > { %v743_v48 = vadd.f32 %v742_v47, %v741_v46 }
 0x31d   : > { %v744_v49 = vrot.slane %v743_v48, 1 }
 0x31f   : > { %v745_v51 = vadd.f32 %v744_v49, %v743_v48 }
 0x321   : > { %v747_v52 = vadd.f32 %v746_v50, %v745_v51 }
 0x323   : > { %v1078_v53 = vmul.f32 -1.442695, %v747_v52 }
 0x325   : > { %1238 = vpow2.f32 %v1078_v53 }
 0x32f   : > { %v1239_v54 = vpop.eup %1238 }
 0x330   : > { %v751_v55 = vadd.f32 1.0, %v1239_v54 }
 0x332   : > { %1240 = vrcp.f32 %v751_v55 }
 0x33c   : > { %v1241_v56 = vpop.eup %1240 }
 0x33d   : > { %v754_v57 = vmul.f32 %v1241_v56, %v747_v52 }
 0x33f   : > { %758 = vperm.xlu0 %1229, %v754_v57  }
 0x3be   : > { %v759_v60 = vpop.permute.xlu0 %758 }
 0x3bf   : > { %v761_v61 = vmul.f32 %v759_v60, %v755_v58 }
 0x3c1   : > { %v764_v62 = vadd.f32 %v763_v59, %v761_v61 }
 0x3c3   : > { %v1079_v63 = vmul.f32 -1.442695, %v764_v62 }
 0x3c5   : > { %1242 = vpow2.f32 %v1079_v63 }
 0x3cf   : > { %v1243_v0 = vpop.eup %1242 }
 0x3d0   : > { %v768_v3 = vadd.f32 1.0, %v1243_v0 }
 0x3d2   : > { %1244 = vrcp.f32 %v768_v3 }
 0x3dc   : > { %v1245_v4 = vpop.eup %1244 }
 0x3dd   : > { %778 = vrot.lane.b32.xlu0 %v1245_v4, %s1399_s21  ;;  %772 = vrot.lane.b32.xlu1 %v1245_v4, %s1400_s24  ;;  %s1411_s21 = smov 60   ;;  %s1412_s24 = smov 48  }
 0x3e1   : > { %784 = vrot.lane.b32.xlu0 %v1245_v4, %s1401_s18  ;;  %775 = vrot.lane.b32.xlu1 %v1245_v4, %s1402_s26  ;;  %s1413_s18 = smov 56  }
 0x3e5   : > { %790 = vrot.lane.b32.xlu0 %v1245_v4, %s1403_s25  ;;  %781 = vrot.lane.b32.xlu1 %v1245_v4, %s1404_s23 }
 0x3e9   : > { %796 = vrot.lane.b32.xlu0 %v1245_v4, %s1405_s16  ;;  %787 = vrot.lane.b32.xlu1 %v1245_v4, %s1406_s27  ;;  %s1089_s16 = sshll.u32 %s1490_s4, 8  ;;  %s367_s27 = scalar_lea.vmem [#allocation8], %s1057_s20 }
 0x3ea   : > { %s953_s4 = scalar_lea.sflag [#allocation5], %s1614_s10 }
 0x3ed   : > { %802 = vrot.lane.b32.xlu0 %v1245_v4, %s1407_s22  ;;  %793 = vrot.lane.b32.xlu1 %v1245_v4, %s1408_s30  ;;  %s966_s22 = sshll.u32 %s367_s27, 4  ;;  %s1745_s22 = int_to_ptr.vmem [resolvable:$true] %s966_s22 }
 0x3ee   : > { %s1304_s20 = scalar_lea.vmem %s1745_s22, 256 }
 0x3ef   : > { %p1305_p4 = scmp.ne.s32.totalorder %s1745_s22, %s1304_s20 }
 0x3f1   : > { %808 = vrot.lane.b32.xlu0 %v1245_v4, %s1409_s15  ;;  %799 = vrot.lane.b32.xlu1 %v1245_v4, %s1410_s19  ;;  %s1742_s19 = scalar_lea.hbm %s1801_s9, %s1089_s16  ;;  %p1306_p6 = pnand %p1305_p4, %p1563_p12 }
 0x3f3   : > { %p1307_p8 = pneg %p1306_p6 }
 0x3f5   : > { %814 = vrot.lane.b32.xlu0 %v1245_v4, %s1411_s21  ;;  %805 = vrot.lane.b32.xlu1 %v1245_v4, %s1412_s24  ;;  %s1414_s21 = smov [#allocation8]  }
 0x3f6   : > { %s1308_s24 = sshll.u32 %s1414_s21, 4  ;;  %s1309_s24 = int_to_ptr.vmem [resolvable:$false] %s1308_s24 }
 0x3f7   : > { %p1311_p10 = scmp.lt.s32.totalorder %s1745_s22, %s1309_s24 }
 0x3f9   : > { %811 = vrot.lane.b32.xlu1 %v1245_v4, %s1413_s18  ;;  %s1310_s18 = scalar_lea.vmem %s1309_s24, 512 }
 0x3fa   : > { %p1312_p13 = scmp.lt.s32.totalorder %s1310_s18, %s1304_s20 }
 0x3fc   : > { %p1313_p3 = por %p1312_p13, %p1311_p10 }
 0x3fe   : > { %p1314_p7 = pnand %p1313_p3, %p1307_p8 }
 0x44f   : > { %v779_v18 = vpop.permute.xlu0 %778  ;;  %v773_v19 = vpop.permute.xlu1 %772 }
 0x450   : > { %v817_v20 = vsel %vm722_vm8, %v1245_v4, %v773_v19  ;;  %vm844_vm8 = vcmask 490496  }
 0x453   : > { %v785_v21 = vpop.permute.xlu0 %784  ;;  %v776_v22 = vpop.permute.xlu1 %775 }
 0x454   : > { %v819_v23 = vsel %vm818_vm10, %v817_v20, %v776_v22 }
 0x455   : > { %v821_v25 = vsel %vm820_vm11, %v819_v23, %v779_v18 }
 0x457   : > { %v791_v24 = vpop.permute.xlu0 %790  ;;  %v782_v26 = vpop.permute.xlu1 %781 }
 0x458   : > { %v823_v27 = vsel %vm822_vm12, %v821_v25, %v782_v26 }
 0x459   : > { %v825_v31 = vsel %vm824_vm13, %v823_v27, %v785_v21 }
 0x45b   : > { %v797_v28 = vpop.permute.xlu0 %796  ;;  %v788_v32 = vpop.permute.xlu1 %787 }
 0x45c   : > { %v827_v33 = vsel %vm826_vm14, %v825_v31, %v788_v32 }
 0x45d   : > { %v829_v34 = vsel %vm828_vm15, %v827_v33, %v791_v24 }
 0x45f   : > { %v794_v35 = vpop.permute.xlu1 %793  ;;  %v803_v36 = vpop.permute.xlu0 %802 }
 0x460   : > { %v831_v37 = vsel %vm830_vm0, %v829_v34, %v794_v35 }
 0x461   : > { %v833_v38 = vsel %vm832_vm1, %v831_v37, %v797_v28 }
 0x463   : > { %v800_v39 = vpop.permute.xlu1 %799  ;;  %v809_v41 = vpop.permute.xlu0 %808 }
 0x464   : > { %v835_v40 = vsel %vm834_vm2, %v833_v38, %v800_v39 }
 0x465   : > { %v837_v42 = vsel %vm836_vm3, %v835_v40, %v803_v36 }
 0x467   : > { %v806_v43 = vpop.permute.xlu1 %805  ;;  %v815_v48 = vpop.permute.xlu0 %814 }
 0x468   : > { %v839_v44 = vsel %vm838_vm4, %v837_v42, %v806_v43 }
 0x469   : > { %v841_v46 = vsel %vm840_vm5, %v839_v44, %v809_v41 }
 0x46b   : > { %v812_v47 = vpop.permute.xlu1 %811 }
 0x46c   : > { %v843_v49 = vsel %vm842_vm6, %v841_v46, %v812_v47 }
 0x46d   : > { %v845_v50 = vsel %vm844_vm8, %v843_v49, %v815_v48 }
 0x46e   : > { %v849_v51 = vrot.slane %v845_v50, %v848_v45 }
 0x470   : > { %v850_v52 = vmul.f32 %v849_v51, %v1704_v30  ;;  %v851_v53 = vmul.f32 %v849_v51, %v1702_v29 }
 0x472   : > { %1116 = vmatprep.mubr.msk.f32.mxu0 %vm568_vm7, %v850_v52 }
 0x473   : > { %1117 = vmatmul.mubr.msk.f32.vlgmr.msra.gmra.mrb[0].mxu0 %vm568_vm7, %v851_v53 }
 0x546   : > { %v1118_v54 = vpop.f32.mrb[0].mxu0 }
 0x547   : > { %v945_v55 = vadd.f32 %v1118_v54, %v1080_v13  ;;  %v939_v56 = vpop.f32.mrb[1].mxu0 }
 0x548   : > { %v940_v30 = vadd.f32 %v1080_v13, %v939_v56 }
 0x549   : > { %v949_v29 = vadd.f32 %v945_v55, %v1631_v2 }
 0x54a   : > { %v948_v57 = vadd.f32 %v940_v30, %v1628_v1 }
 0x54b   : > { %951 = vst.msk [vmem:[%s367_s27 + $0x8] sm:$0xff] %vm568_vm7, %v949_v29 }
 0x54c   : > { %950 = vst.msk [vmem:[%s367_s27] sm:$0xff] %vm568_vm7, %v948_v57 }
 0x54d   : > { %1317 = shalt.err (!%p1314_p7)
}
 0x54e   : > { %s1318_s25 = scalar_lea.hbm %s1742_s19, 256  ;;  %s1322_s27 = scalar_lea.hbm %s1801_s9, 512 }
 0x54f   : > { %p1319_p9 = scmp.ne.s32.totalorder %s1742_s19, %s1318_s25  ;;  %p1323_p5 = scmp.lt.u32.totalorder %s1742_s19, %s1801_s9 }
 0x550   : > { %p1324_p11 = scmp.lt.u32.totalorder %s1322_s27, %s1318_s25  ;;  %p1326_p4 = scmp.lt.u32.totalorder %s1318_s25, %s1742_s19 }
 0x551   : > { %p1320_p1 = pnand %p1319_p9, %p1563_p12 }
 0x552   : > { %p1325_p2 = por %p1324_p11, %p1323_p5 }
 0x553   : > { %p1321_p0 = pneg %p1320_p1 }
 0x554   : > { %p1327_p6 = por %p1326_p4, %p1325_p2 }
 0x556   : > { %p1328_p8 = pnand %p1327_p6, %p1321_p0 }
 0x558   : > { %1331 = shalt.err (!%p1328_p8)
}
 0x559   : > { %s1415_s20 = smov 128  }
 0x55a   : > { %1141 = dma.vmem_to_hbm [thread:$0]  (%p1563_p12), %s1745_s22, 256, %s1742_s19, %s953_s4, %s1415_s20, %s1415_s20, %s1402_s26  }
 0x55b PF: > { %s981_s21 = sand.u32 1, %s1362_s11   ;;  %p1823_p10 = scmp.ne.s32.totalorder %s1809_s17, 0 }
 0x55c   : > { %p1824_p13 = scmp.ge.s32.totalorder %s1374_s14, 2  ;;  %s982_s24 = scalar_lea.sflag [#allocation5], %s981_s21 }
 0x55e   : > { %p1152_p3 = pnand %p1824_p13, %p1823_p10 }
 0x560   : > { %1357 = dma.done.wait (!%p1152_p3), %s982_s24, 256  }
 0x561   : > { %1359 = vsyncadd (!%p1152_p3), %s982_s24, 4294967040  ;;  %s1825_s14 = sld [smem:[#allocation12_spill]]  ;;  %s1826_s11 = smov %s1366_s12 }
 0x562   : > { %s1827_s12 = smov %s1370_s13  ;;  %s1828_s13 = smov %s1559_s28 }
 0x567   : > { %p25_p7 = scmp.ge.s32.totalorder %s1825_s14, 4  }
 0x569   :  { %27 = sbr.rel (!%p25_p7) target bundleno = 9 (0x9), region = 107 }
 0x570   :  { %987 = vsyncpa [#allocation4], 1 }
 0x571   :  { %989 = vsyncpa [#allocation4 + $0x1], 1 }
 0x572   :  { %990 = vsyncpa [#allocation7], 1 }
 0x573   :  { %991 = vsyncpa [#allocation5], 1 }
 0x574   :  { %993 = vsyncpa [#allocation5 + $0x1], 1 }

</bundles_post_ra>
